<compile_context>
chip_gen: v7x
topology: tpu7x:2x2x1
jax: 0.10.0
libtpu: 0.0.40
codegen_flags: <defaults>
</compile_context>

<pallas_src>
import math

import jax
import jax.numpy as jnp
from jax.experimental import pallas as pl
from jax.experimental.pallas import tpu as pltpu


def _round_up(n: int, m: int) -> int:
    return ((n + m - 1) // m) * m


def _step_embedding_kernel(x_ref, out_ref):
    # x_ref   : (TB, 1)  float32 timesteps (one per row)
    # out_ref : (TB, E)  output, [ sin(x*div) | cos(x*div) ]
    E = out_ref.shape[-1]
    half = E // 2

    # div_term in-kernel: iota (VPU) + exp (EUP slot, effectively free) — removes
    # an input DMA stream + its double buffer.
    k = jax.lax.broadcasted_iota(jnp.int32, (1, half), 1).astype(jnp.float32)
    div = jnp.exp(k * jnp.float32(-(math.log(10000.0) / (half - 1))))  # (1, half)

    arg = x_ref[...] * div  # (TB, half) broadcasted outer product on the VPU

    # Two direct slice stores (no concatenated (TB, E) temporary, no relayout).
    out_ref[:, :half] = jnp.sin(arg).astype(out_ref.dtype)
    out_ref[:, half:] = jnp.cos(arg).astype(out_ref.dtype)


def _choose_row_tile(B: int, E: int, block_rows: int) -> int:
    """Pick TB: multiple of 8, >= 4 grid steps for large B, within v5e VMEM."""
    # VMEM budget: stay well inside v5e's 16 MiB default scoped-VMEM. Account for
    # the double-buffered f32 output tile plus arg/sin/cos temporaries (~4 rows'
    # worth of E f32 each).
    vmem_budget = 8 * 1024 * 1024
    bytes_per_row = 4 * E * 4  # 2x out (double buffer) + ~2x temps, f32
    tb_vmem = max(8, (vmem_budget // max(bytes_per_row, 1)) // 8 * 8)

    # Split the batch into >= ~4 steps so v7x's 2 TensorCores both get work,
    # but keep a floor of 256 rows to amortize the ~0.35 us per-step overhead.
    tb_split = max(256, _round_up(pl.cdiv(B, 4), 8))

    tb = min(block_rows, tb_vmem, tb_split)
    tb = min(tb, _round_up(B, 8))  # never bigger than the (8-rounded) batch
    return max(8, _round_up(tb, 8))


def step_embedding(
    x: jax.Array,
    embedding_dim: int,
    *,
    block_rows: int = 1024,
    out_dtype=jnp.float32,
) -> jax.Array:
    """Sinusoidal step embedding for float timesteps x of shape [B]."""
    assert embedding_dim % 2 == 0
    # half_dim == 1 would divide by zero in the div_term formula (same as PyTorch).
    assert embedding_dim >= 4, "embedding_dim must be >= 4"

    B = x.shape[0]
    x2 = x.astype(jnp.float32).reshape(B, 1)

    TB = _choose_row_tile(B, embedding_dim, block_rows)
    grid = (pl.cdiv(B, TB),)  # ragged last block handled by Pallas (masked writes)

    out = pl.pallas_call(
        _step_embedding_kernel,
        out_shape=jax.ShapeDtypeStruct((B, embedding_dim), out_dtype),
        grid=grid,
        in_specs=[pl.BlockSpec((TB, 1), lambda i: (i, 0))],
        out_specs=pl.BlockSpec((TB, embedding_dim), lambda i: (i, 0)),
        compiler_params=pltpu.CompilerParams(
            # Batch axis is embarrassingly parallel -> shard across v7x's 2 TCs.
            dimension_semantics=("parallel",),
        ),
        cost_estimate=pl.CostEstimate(
            flops=2 * B * embedding_dim,
            transcendentals=B * embedding_dim,
            bytes_accessed=4 * B + B * embedding_dim * jnp.dtype(out_dtype).itemsize,
        ),
    )(x2)
    return out


def _reference(x: jax.Array, embedding_dim: int) -> jax.Array:
    half_dim = embedding_dim // 2
    div_term = jnp.exp(
        jnp.arange(half_dim, dtype=jnp.float32) * -(math.log(10000.0) / (half_dim - 1))
    )
    arg = x.astype(jnp.float32)[:, None] * div_term[None]
    return jnp.concatenate([jnp.sin(arg), jnp.cos(arg)], axis=1)


if __name__ == "__main__":
    key = jax.random.PRNGKey(0)

    # --- small test (module-typical CFM timesteps in [0, 1)) ------------------
    B = 8
    embedding_dim = 32
    x = jax.random.uniform(key, (B,), dtype=jnp.float32)

    out = jax.block_until_ready(step_embedding(x, embedding_dim))
    ref = _reference(x, embedding_dim)
    assert out.shape == (B, embedding_dim), out.shape
    assert jnp.allclose(out, ref, atol=1e-5, rtol=1e-5), "mismatch vs reference (small)"

    # --- second check: multi-step grid + ragged (masked) last block -----------
    B2, dim2 = 300, 256
    x2 = jax.random.uniform(jax.random.PRNGKey(1), (B2,), dtype=jnp.float32)
    out2 = jax.block_until_ready(step_embedding(x2, dim2, block_rows=128))
    ref2 = _reference(x2, dim2)
    assert out2.shape == (B2, dim2), out2.shape
    assert jnp.allclose(out2, ref2, atol=1e-5, rtol=1e-5), "mismatch vs reference (ragged)"

    # NOTE: for tiny shapes like (8, 32) a standalone pallas_call is pure launch
    # overhead; in production fuse this into the consumer or let XLA handle it.
    print("KERNEL_OK")
</pallas_src>

<mosaic_0001>
module attributes {stable_mosaic.version = 11 : i64} {
  func.func @_step_embedding_kernel(%arg0: i32, %arg1: memref<8x1xf32, #tpu.memory_space<vmem>>, %arg2: memref<8x32xf32, #tpu.memory_space<vmem>>) attributes {dimension_semantics = [#tpu.dimension_semantics<parallel>], iteration_bounds = array<i64: 1>, scalar_prefetch = 0 : i64, scratch_operands = 0 : i64, tpu.core_type = #tpu.core_type<tc>, window_params = [{transform_indices = @transform_0, window_bounds = array<i64: 8, 1>}, {transform_indices = @transform_1, window_bounds = array<i64: 8, 32>}]} {
    %0 = tpu.iota {dimensions = array<i32: 1>} : vector<1x16xi32>
    %1 = arith.sitofp %0 : vector<1x16xi32> to vector<1x16xf32>
    %cst = arith.constant -0.614022672 : f32
    %2 = vector.broadcast %cst : f32 to vector<1x16xf32>
    %3 = arith.mulf %1, %2 : vector<1x16xf32>
    %4 = math.exp %3 : vector<1x16xf32>
    %c0 = arith.constant 0 : index
    %c0_0 = arith.constant 0 : index
    %5 = vector.load %arg1[%c0, %c0_0] : memref<8x1xf32, #tpu.memory_space<vmem>>, vector<8x1xf32>
    %6 = vector.broadcast %5 : vector<8x1xf32> to vector<8x16xf32>
    %7 = vector.broadcast %4 : vector<1x16xf32> to vector<8x16xf32>
    %8 = arith.mulf %6, %7 : vector<8x16xf32>
    %9 = math.sin %8 : vector<8x16xf32>
    %c0_1 = arith.constant 0 : index
    %c0_2 = arith.constant 0 : index
    %10 = vector.load %arg2[%c0_1, %c0_2] : memref<8x32xf32, #tpu.memory_space<vmem>>, vector<8x16xf32>
    tpu.vector_store %arg2[%c0_1, %c0_2], %9 {strides = array<i32>} : memref<8x32xf32, #tpu.memory_space<vmem>>, vector<8x16xf32>,
    %11 = math.cos %8 : vector<8x16xf32>
    %c0_3 = arith.constant 0 : index
    %c16 = arith.constant 16 : index
    %12 = vector.load %arg2[%c0_3, %c16] : memref<8x32xf32, #tpu.memory_space<vmem>>, vector<8x16xf32>
    tpu.vector_store %arg2[%c0_3, %c16], %11 {strides = array<i32>} : memref<8x32xf32, #tpu.memory_space<vmem>>, vector<8x16xf32>,
    return
  }
  func.func @transform_0(%arg0: i32) -> (i32, i32) {
    %c0_i32 = arith.constant 0 : i32
    %c0_i32_0 = arith.constant 0 : i32
    return %arg0, %c0_i32 : i32, i32
  }
  func.func @transform_1(%arg0: i32) -> (i32, i32) {
    %c0_i32 = arith.constant 0 : i32
    %c0_i32_0 = arith.constant 0 : i32
    return %arg0, %c0_i32 : i32, i32
  }
}

</mosaic_0001>

<bundles_post_ra>
// kernel: tpu_custom_call.1
= control target key start
LH: loop header
LB: loop body
LE: loop exit
PB: predicated region body
PF: predicated region fallthrough
CT: control target
= control target key end

     0   :  { %v303_v1 = vmov 0   ;;  %s359_s0 = inlined_call_operand.vmem [shape: f32[8,1], index: 0, kind: input, shape index: {}]   ;;  %s360_s1 = inlined_call_operand.hbm [shape: f32[8,32], index: 1, kind: output, shape index: {}]  }
   0x1   :  { %v15_v0 = vld [vmem:[%s359_s0] sm:$0xff]  ;;  %272 = vset.pattern.permute.xlu0 %v303_v1 }
   0x2   :  { %18 = vperm.xlu0 %272, %v15_v0  }
   0x3   :  { %6 = vsyncpa [#allocation3], 0  ;;  %v9_v2 = vlaneseq  ;;  %v304_v20 = vmov 683565275   ;;  %v305_v22 = vmov 2475754826  }
   0x4   :  { %v306_v25 = vmov 2131351028   ;;  %v307_v28 = vmov 2102212464   ;;  %v308_v31 = vmov 920167782  }
   0x5   :  { %v10_v3 = vand.u32 127, %v9_v2  ;;  %v309_v34 = vmov 1326507024   ;;  %vm126_vm11 = vcmask 130048   ;;  %s310_s0 = smov 16   ;;  %s311_s8 = smov [#allocation2]  }
   0x6   :  { %s243_s9 = sshll.u32 %s311_s8, 4  ;;  %s244_s9 = int_to_ptr.vmem [resolvable:$true] %s243_s9 }
   0x7   :  { %v11_v4 = vcvt.s32.f32 %v10_v3  ;;  %s279_s10 = scalar_lea.vmem %s244_s9, 128  ;;  %p284_p1 = scmp.lt.s32.totalorder %s244_s9, %s244_s9 }
   0x8   :  { %p280_p0 = scmp.ne.s32.totalorder %s244_s9, %s279_s10  ;;  %p285_p2 = scmp.lt.s32.totalorder %s279_s10, %s279_s10 }
   0x9   :  { %v12_v5 = vmul.f32 -0.6140227, %v11_v4 }
   0xa   :  { %p286_p3 = por %p285_p2, %p284_p1 }
   0xb   :  { %v13_v6 = vmul.f32 1.442695, %v12_v5 }
   0xc   :  { %p287_p4 = pnand %p286_p3, %p280_p0 }
   0xd   :  { %273 = vpow2.f32 %v13_v6 }
  0x17   :  { %v274_v7 = vpop.eup %273 }
  0x81   :  { %v19_v8 = vpop.permute.xlu0 %18 }
  0x82   :  { %v325_v9 = vmul.f32 %v274_v7, %v19_v8 }
  0x84   :  { %v25_v10 = vand.u32 2139095040, %v325_v9  ;;  %v22_v14 = vand.u32 2147483647, %v325_v9  ;;  %vm24_vm7 = vcmp.lt.s32.totalorder %v325_v9, 0 }
  0x86   :  { %v26_v11 = vshrl.u32 %v25_v10, 23  ;;  %v29_v17 = vand.u32 8388607, %v22_v14  ;;  %vm23_vm8 = vcmp.le.f32.partialorder %v22_v14, 0.7853982 }
  0x88   :  { %v251_v12 = vadd.s32 4294967169, %v26_v11  ;;  %v30_v36 = vor.u32 8388608, %v29_v17 }
  0x8a   :  { %v32_v13 = vadd.s32 1, %v251_v12  ;;  %v70_v50 = vshll.u32 %v30_v36, 8 }
  0x8c   :  { %vm33_vm0 = vcmp.gt.s32.totalorder %v32_v13, 0 }
  0x8d   :  { %v34_v15 = vsel %vm33_vm0, %v32_v13, 0  ;;  %vm114_vm0 = vweird.f32 %v325_v9 }
  0x8e   :  { %v36_v16 = vand.u32 31, %v34_v15  ;;  %v35_v19 = vshrl.u32 %v34_v15, 5 }
  0x90   :  { %v37_v18 = vsub.s32 32, %v36_v16  ;;  %v39_v21 = vshll.u32 %v304_v20, %v36_v16  ;;  %v42_v23 = vshll.u32 %v305_v22, %v36_v16  ;;  %v45_v27 = vshll.u32 %v306_v25, %v36_v16 }
  0x91   :  { %v48_v30 = vshll.u32 %v307_v28, %v36_v16  ;;  %v51_v33 = vshll.u32 %v308_v31, %v36_v16  ;;  %vm54_vm1 = vcmp.lt.s32.totalorder %v35_v19, 1  ;;  %vm57_vm2 = vcmp.lt.s32.totalorder %v35_v19, 4 }
  0x92   :  { %v40_v24 = vshrl.u32 %v305_v22, %v37_v18  ;;  %v43_v26 = vshrl.u32 %v306_v25, %v37_v18  ;;  %v46_v29 = vshrl.u32 %v307_v28, %v37_v18  ;;  %v49_v32 = vshrl.u32 %v308_v31, %v37_v18 }
  0x93   :  { %v52_v35 = vshrl.u32 %v309_v34, %v37_v18  ;;  %v38_v45 = vshrl.u32 %v304_v20, %v37_v18  ;;  %vm56_vm3 = vcmp.lt.s32.totalorder %v35_v19, 3  ;;  %vm55_vm4 = vcmp.lt.s32.totalorder %v35_v19, 2 }
  0x94   :  { %v41_v37 = vor.u32 %v40_v24, %v39_v21  ;;  %v44_v38 = vor.u32 %v43_v26, %v42_v23  ;;  %v47_v39 = vor.u32 %v46_v29, %v45_v27  ;;  %v50_v40 = vor.u32 %v49_v32, %v48_v30 }
  0x95   :  { %v53_v41 = vor.u32 %v52_v35, %v51_v33 }
  0x96   :  { %v59_v42 = vsel %vm57_vm2, %v47_v39, 2102212464  ;;  %v62_v43 = vsel %vm54_vm1, %v41_v37, %v44_v38  ;;  %v66_v44 = vsel %vm54_vm1, %v44_v38, %v47_v39  ;;  %v63_v46 = vsel %vm57_vm2, %v50_v40, 920167782 }
  0x97   :  { %v67_v47 = vsel %vm57_vm2, %v53_v41, 1326507024  ;;  %v64_v48 = vsel %vm56_vm3, %v47_v39, %v63_v46  ;;  %v58_v51 = vsel %vm54_vm1, %v38_v45, %v41_v37  ;;  %v60_v52 = vsel %vm56_vm3, %v44_v38, %v59_v42 }
  0x98   :  { %v68_v49 = vsel %vm56_vm3, %v50_v40, %v67_v47  ;;  %v65_v53 = vsel %vm55_vm4, %v62_v43, %v64_v48  ;;  %v61_v59 = vsel %vm55_vm4, %v58_v51, %v60_v52  ;;  %vm235_vm1 = vcmask 261248  }
  0x99   :  { %v69_v54 = vsel %vm55_vm4, %v66_v44, %v68_v49  ;;  %v334_v57 = vmul.u32.u64.low %v70_v50, %v65_v53  ;;  %v335_v58 = vmul.u32.u64.high %v70_v50, %v65_v53, %v334_v57  ;;  %v77_v61 = vmul.u32 %v70_v50, %v61_v59 }
  0x9a   :  { %v331_v55 = vmul.u32.u64.low %v70_v50, %v69_v54  ;;  %v332_v56 = vmul.u32.u64.high %v70_v50, %v69_v54, %v331_v55 }
  0x9b   :  { %v80_v60 = vadd.s32 1, %v335_v58 }
  0x9c   :  { %vm79_vm5 = vc.u32 %v332_v56, %v334_v57  ;;  %v78_v10 = vadd.s32 %v334_v57, %v332_v56 }
  0x9d   :  { %v81_v62 = vsel %vm79_vm5, %v80_v60, %v335_v58 }
  0x9e   :  { %v82_v63 = vadd.s32 %v81_v62, %v77_v61 }
  0xa0   :  { %v83_v0 = vadd.s32 536870912, %v82_v63 }
  0xa2   :  { %v84_v1 = vshrl.u32 %v83_v0, 30 }
  0xa4   :  { %v85_v2 = vshll.u32 %v84_v1, 30  ;;  %v108_v23 = vsub.s32 4, %v84_v1 }
  0xa6   :  { %v86_v3 = vsub.s32 %v82_v63, %v85_v2  ;;  %v109_v26 = vsel %vm24_vm7, %v108_v23, %v84_v1 }
  0xa7   :  { %v111_v28 = vsel %vm23_vm8, 0, %v109_v26 }
  0xa8   :  { %v88_v4 = vsub.s32 0, %v86_v3  ;;  %v115_v29 = vadd.s32 3, %v111_v28  ;;  %v221_v31 = vand.u32 3, %v111_v28 }
  0xaa   :  { %v252_v5 = vmin.u32 %v88_v4, %v86_v3  ;;  %v116_v30 = vand.u32 3, %v115_v29  ;;  %vm226_vm10 = vcmp.eq.s32.totalorder %v221_v31, 2  ;;  %vm223_vm13 = vcmp.eq.s32.totalorder %v221_v31, 0 }
  0xab   :  { %vm222_vm15 = vcmp.lt.s32.totalorder %v221_v31, 2 }
  0xac   :  { %v90_v6 = vclz %v252_v5  ;;  %vm121_vm9 = vcmp.eq.s32.totalorder %v116_v30, 2  ;;  %vm118_vm12 = vcmp.eq.s32.totalorder %v116_v30, 0  ;;  %vm117_vm14 = vcmp.lt.s32.totalorder %v116_v30, 2 }
  0xae   :  { %v253_v7 = vadd.s32 4294967294, %v90_v6 }
  0xb0   :  { %vm254_vm6 = vcmp.lt.s32.totalorder %v253_v7, 0 }
  0xb1   :  { %v93_v8 = vsel %vm254_vm6, 0, %v253_v7 }
  0xb2   :  { %v94_v11 = vsub.s32 32, %v93_v8  ;;  %v98_v12 = vsub.s32 4294967266, %v93_v8  ;;  %v95_v13 = vshll.u32 %v86_v3, %v93_v8 }
  0xb4   :  { %v96_v15 = vshrl.u32 %v78_v10, %v94_v11  ;;  %v99_v16 = vadd.s32 127, %v98_v12 }
  0xb6   :  { %v97_v17 = vor.u32 %v96_v15, %v95_v13  ;;  %v100_v18 = vshll.u32 %v99_v16, 23 }
  0xb8   :  { %v101_v19 = vor.u32 4788187, %v100_v18  ;;  %v104_v21 = vcvt.s32.f32 %v97_v17 }
  0xba   :  { %v102_v20 = vand.u32 2147483647, %v101_v19 }
  0xbc   :  { %v105_v22 = vmul.f32 %v104_v21, %v102_v20 }
  0xbe   :  { %v106_v24 = vxor.u32 2147483648, %v105_v22 }
  0xc0   :  { %v107_v25 = vsel %vm24_vm7, %v106_v24, %v105_v22 }
  0xc1   :  { %v110_v27 = vsel %vm23_vm8, %v325_v9, %v107_v25 }
  0xc2   :  { %275 = vcosq.f32 %v110_v27 }
  0xc3   :  { %277 = vsinq.f32 %v110_v27 }
  0xcc   :  { %v276_v32 = vpop.eup %275 }
  0xcd   :  { %v278_v33 = vpop.eup %277  ;;  %v122_v34 = vxor.u32 2147483648, %v276_v32 }
  0xce   :  { %v119_v35 = vxor.u32 2147483648, %v278_v33 }
  0xcf   :  { %v228_v36 = vsel %vm226_vm10, %v122_v34, %v278_v33  ;;  %v123_v14 = vsel %vm121_vm9, %v122_v34, %v278_v33 }
  0xd0   :  { %v225_v37 = vsel %vm223_vm13, %v276_v32, %v119_v35  ;;  %v120_v38 = vsel %vm118_vm12, %v276_v32, %v119_v35 }
  0xd1   :  { %v229_v39 = vsel %vm222_vm15, %v225_v37, %v228_v36  ;;  %v124_v40 = vsel %vm117_vm14, %v120_v38, %v123_v14 }
  0xd2   :  { %v230_v41 = vsel %vm114_vm0, nan, %v229_v39  ;;  %v125_v42 = vsel %vm114_vm0, nan, %v124_v40 }
  0xd3   :  { %232 = vrot.lane.b32.xlu0 %v230_v41, %s310_s0  ;;  %127 = vst.msk [vmem:[#allocation2] sm:$0xff] %vm126_vm11, %v125_v42 }
 0x145   :  { %v233_v43 = vpop.permute.xlu0 %232 }
 0x146   :  { %236 = vst.msk [vmem:[#allocation2] sm:$0xff] %vm235_vm1, %v233_v43 }
 0x147   :  { %290 = shalt.err (!%p287_p4)
}
 0x148   :  { %s291_s13 = scalar_lea.hbm %s360_s1, 128 }
 0x149   :  { %p292_p5 = scmp.ne.s32.totalorder %s360_s1, %s291_s13  ;;  %p295_p6 = scmp.lt.u32.totalorder %s291_s13, %s360_s1 }
 0x14b   :  { %p297_p7 = pnand %p295_p6, %p292_p5 }
 0x14d   :  { %300 = shalt.err (!%p297_p7)
}
 0x14e   :  { %246 = dma.vmem_to_hbm [thread:$0]  %s244_s9, 128, %s360_s1, [#allocation3]  }
 0x14f   :  { %301 = dma.done.wait [#allocation3], 128  }
 0x150   :  { %302 = vsyncadd [#allocation3], 4294967168 }
 0x151   :  { %250 = vsyncpa [#allocation3], 1 }

</bundles_post_ra>
